<compile_context>
chip_gen: v7x
topology: tpu7x:2x2x1
jax: 0.10.0
libtpu: 0.0.40
codegen_flags: <defaults>
</compile_context>

<pallas_src>
import jax
import jax.numpy as jnp
from jax.experimental import pallas as pl
from jax.experimental.pallas import tpu as pltpu


def _round_up(n: int, m: int) -> int:
    return ((n + m - 1) // m) * m


def _linear_svm_kernel(x_ref, m_ref, b_ref, o_ref):
    # x_ref: (Rt, 128) VMEM   -- 4 batch rows of 32 features packed per row
    # m_ref: (128, 4)  VMEM   -- block-diagonal kron(I_4, w^T), resident
    # b_ref: (1,)      SMEM   -- bias scalar
    # o_ref: (1, Rt, 4) VMEM  -- o[0, r, c] = y[4r + c]
    acc = jnp.dot(x_ref[...], m_ref[...], preferred_element_type=jnp.float32)
    o_ref[0] = (acc + b_ref[0]).astype(o_ref.dtype)


def linear_svm_forward(x, weight, bias, *, block_rows: int = 32768):
    """y = x @ weight.T + bias  (equivalent to torch nn.Linear(32, 1)).

    x: (B, 32), weight: (1, 32) in the PyTorch (out, in) layout, bias: (1,).
    Returns (B, 1) in x.dtype (f32 accumulation inside the kernel).
    """
    B, K = x.shape
    assert weight.shape == (1, K) and bias.shape == (1,)
    assert K == 32, "LinearSVM is fixed at 32 input features"
    PACK = 128 // K          # 4 batch rows packed per lane-dense VMEM row
    ALIGN = 512              # batch rows; keeps packed tiles (8,128)-aligned

    # Batch tile: big enough to amortize per-grid-step overhead, capped near
    # half the batch so G>=2 (dual-TC on v7x) whenever possible.
    Bt = min(block_rows, _round_up(-(-B // 2), ALIGN))
    Bt = max(ALIGN, _round_up(Bt, ALIGN))
    Bt = min(Bt, _round_up(B, ALIGN))
    B_pad = _round_up(B, Bt)
    if B_pad != B:
        x = jnp.pad(x, ((0, B_pad - B), (0, 0)))
    G = B_pad // Bt
    Rt = Bt // PACK

    # Free reshape: (B_pad, 32) -> (B_pad//4, 128); every lane becomes live.
    xp = x.reshape(B_pad // PACK, PACK * K)

    # Block-diagonal weight: (xp @ M)[r, c] = sum_k x[4r + c, k] * w[k].
    m = jnp.kron(jnp.eye(PACK, dtype=x.dtype),
                 weight.reshape(K, 1).astype(x.dtype))

    out = pl.pallas_call(
        _linear_svm_kernel,
        out_shape=jax.ShapeDtypeStruct((G, Rt, PACK), x.dtype),
        grid_spec=pltpu.PrefetchScalarGridSpec(
            num_scalar_prefetch=0,
            grid=(G,),
            in_specs=[
                # x: streamed over batch tiles, double-buffered by Pallas.
                pl.BlockSpec((Rt, PACK * K), lambda i: (i, 0)),
                # M: same block every step -> stays resident in VMEM.
                pl.BlockSpec((PACK * K, PACK), lambda i: (0, 0)),
                # bias: scalar in SMEM (no VMEM tile / extra DMA stream).
                pl.BlockSpec(memory_space=pltpu.MemorySpace.SMEM),
            ],
            out_specs=pl.BlockSpec((1, Rt, PACK), lambda i: (i, 0, 0)),
        ),
        compiler_params=pltpu.CompilerParams(
            dimension_semantics=("parallel",),     # grid steps independent
            vmem_limit_bytes=40 * 1024 * 1024,     # padded out tile counts 32x
        ),
    )(xp, m, bias)

    # (G, Rt, 4) is row-major contiguous over the padded batch -> free reshape.
    return out.reshape(B_pad)[:B].reshape(B, 1)


if __name__ == "__main__":
    key = jax.random.PRNGKey(0)
    kx, kw, kb = jax.random.split(key, 3)

    B, IN, OUT = 8, 32, 1

    # Deterministic params (mimic nn.Linear uniform(-1/sqrt(in), 1/sqrt(in))).
    # Inputs are snapped to the bf16 grid so the check is robust to how many
    # MXU passes the f32 matmul uses (kernel and reference then agree ~1e-7).
    bound = 1.0 / jnp.sqrt(jnp.float32(IN))
    w = jax.random.uniform(kw, (OUT, IN), jnp.float32, -bound, bound)
    w = w.astype(jnp.bfloat16).astype(jnp.float32)
    b = jax.random.uniform(kb, (OUT,), jnp.float32, -bound, bound)
    x = jax.random.normal(kx, (B, IN), jnp.float32)
    x = x.astype(jnp.bfloat16).astype(jnp.float32)

    y = linear_svm_forward(x, w, b)
    jax.block_until_ready(y)

    # Reference check in plain JAX.
    y_ref = x @ w.T + b
    assert y.shape == (B, OUT)
    assert jnp.allclose(y, y_ref, atol=1e-5, rtol=1e-5)

    print("KERNEL_OK")
</pallas_src>

<mosaic_0001>
module attributes {stable_mosaic.version = 11 : i64} {
  func.func @_linear_svm_kernel(%arg0: i32, %arg1: memref<128x128xf32, #tpu.memory_space<vmem>>, %arg2: memref<128x4xf32, #tpu.memory_space<vmem>>, %arg3: memref<1xf32, #tpu.memory_space<smem>>, %arg4: memref<1x128x4xf32, #tpu.memory_space<vmem>>) attributes {dimension_semantics = [#tpu.dimension_semantics<parallel>], iteration_bounds = array<i64: 1>, scalar_prefetch = 0 : i64, scratch_operands = 0 : i64, tpu.core_type = #tpu.core_type<tc>, window_params = [{transform_indices = @transform_0, window_bounds = array<i64: 128, 128>}, {pipeline_mode = #tpu.pipeline_mode<synchronous>, transform_indices = @transform_1, window_bounds = array<i64: 128, 4>}, {transform_indices = @transform_2, window_bounds = array<i64: 1>}, {transform_indices = @transform_3, window_bounds = array<i64: 1, 128, 4>}]} {
    %c0 = arith.constant 0 : index
    %c0_0 = arith.constant 0 : index
    %0 = vector.load %arg1[%c0, %c0_0] : memref<128x128xf32, #tpu.memory_space<vmem>>, vector<128x128xf32>
    %c0_1 = arith.constant 0 : index
    %c0_2 = arith.constant 0 : index
    %1 = vector.load %arg2[%c0_1, %c0_2] : memref<128x4xf32, #tpu.memory_space<vmem>>, vector<128x4xf32>
    %cst = arith.constant dense<0.000000e+00> : vector<128x4xf32>
    %2 = tpu.matmul %0, %1, %cst {dimension_numbers = #tpu.dot_dimension_numbers<[1], [0], [0], [1], [0, 0, 1, 1], [], []>} : vector<128x128xf32>, vector<128x4xf32>, vector<128x4xf32> -> vector<128x4xf32>
    %c0_3 = arith.constant 0 : index
    %3 = memref.load %arg3[%c0_3] : memref<1xf32, #tpu.memory_space<smem>>
    %4 = vector.broadcast %3 : f32 to vector<128x4xf32>
    %5 = arith.addf %2, %4 : vector<128x4xf32>
    %c0_4 = arith.constant 0 : index
    %c0_5 = arith.constant 0 : index
    %c0_6 = arith.constant 0 : index
    %6 = vector.load %arg4[%c0_4, %c0_5, %c0_6] : memref<1x128x4xf32, #tpu.memory_space<vmem>>, vector<1x128x4xf32>
    %7 = vector.shape_cast %6 : vector<1x128x4xf32> to vector<128x4xf32>
    %8 = vector.shape_cast %5 : vector<128x4xf32> to vector<1x128x4xf32>
    tpu.vector_store %arg4[%c0_4, %c0_5, %c0_6], %8 {strides = array<i32>} : memref<1x128x4xf32, #tpu.memory_space<vmem>>, vector<1x128x4xf32>,
    return
  }
  func.func @transform_0(%arg0: i32) -> (i32, i32) {
    %c0_i32 = arith.constant 0 : i32
    %c0_i32_0 = arith.constant 0 : i32
    return %arg0, %c0_i32 : i32, i32
  }
  func.func @transform_1(%arg0: i32) -> (i32, i32) {
    %c0_i32 = arith.constant 0 : i32
    %c0_i32_0 = arith.constant 0 : i32
    %c0_i32_1 = arith.constant 0 : i32
    return %c0_i32, %c0_i32_0 : i32, i32
  }
  func.func @transform_2(%arg0: i32) -> i32 {
    %c0_i32 = arith.constant 0 : i32
    %c0_i32_0 = arith.constant 0 : i32
    return %c0_i32 : i32
  }
  func.func @transform_3(%arg0: i32) -> (i32, i32, i32) {
    %c0_i32 = arith.constant 0 : i32
    %c0_i32_0 = arith.constant 0 : i32
    %c0_i32_1 = arith.constant 0 : i32
    return %arg0, %c0_i32, %c0_i32_0 : i32, i32, i32
  }
}

</mosaic_0001>

<bundles_post_ra>
// kernel: tpu_custom_call.1
= control target key start
LH: loop header
LB: loop body
LE: loop exit
PB: predicated region body
PF: predicated region fallthrough
CT: control target
= control target key end

     0   :  { %vm194_vm0 = vcmask 31744   ;;  %s534_s1 = inlined_call_operand.vmem [shape: f32[128,4], index: 1, kind: input, shape index: {}]   ;;  %s535_s0 = inlined_call_operand.vmem [shape: f32[128,128], index: 0, kind: input, shape index: {}]   ;;  %s536_s2 = inlined_call_operand.<no memory space> [shape: f32[1], index: 2, kind: input, shape index: {}]   ;;  %s537_s3 = inlined_call_operand.vmem [shape: f32[1,128,4], index: 3, kind: output, shape index: {}]  }
   0x1   :  { %v31_v0 = vld [vmem:[%s534_s1] sm:$0xff]  ;;  %v32_v1 = vld [vmem:[%s534_s1 + $0x8] sm:$0xff]  ;;  %v33_v2 = vld [vmem:[%s534_s1 + $0x10] sm:$0xff]  ;;  %v48_v40 = vstv %s536_s2 }
   0x2   :  { %v303_v3 = vpack.c.bf16 %v32_v1, %v31_v0  ;;  %v34_v4 = vld [vmem:[%s534_s1 + $0x18] sm:$0xff]  ;;  %v35_v6 = vld [vmem:[%s534_s1 + $0x20] sm:$0xff]  ;;  %v36_v7 = vld [vmem:[%s534_s1 + $0x28] sm:$0xff] }
   0x3   :  { %v307_v5 = vpack.c.bf16 %v34_v4, %v33_v2  ;;  %v311_v8 = vpack.c.bf16 %v36_v7, %v35_v6  ;;  %v15_v9 = vld [vmem:[%s535_s0] sm:$0xff]  ;;  %v37_v11 = vld [vmem:[%s534_s1 + $0x30] sm:$0xff]  ;;  %v38_v12 = vld [vmem:[%s534_s1 + $0x38] sm:$0xff] }
   0x4   :  { %304 = vmatprep.subr.bf16.mxu0 %v303_v3  ;;  %335 = vmatprep.subr.bf16.mxu1 %v303_v3  ;;  %v23_v10 = vld [vmem:[%s535_s0 + $0x40] sm:$0xff]  ;;  %v315_v13 = vpack.c.bf16 %v38_v12, %v37_v11  ;;  %v40_v15 = vld [vmem:[%s534_s1 + $0x48] sm:$0xff]  ;;  %v41_v17 = vld [vmem:[%s534_s1 + $0x50] sm:$0xff] }
   0x5   :  { %306 = vmatpush3.bf16.msra.mxu0 %v303_v3  ;;  %343 = vmatpush3.bf16.msra.mxu1 %v303_v3  ;;  %v39_v14 = vld [vmem:[%s534_s1 + $0x40] sm:$0xff]  ;;  %v42_v18 = vld [vmem:[%s534_s1 + $0x58] sm:$0xff]  ;;  %v44_v21 = vld [vmem:[%s534_s1 + $0x68] sm:$0xff] }
   0x6   :  { %308 = vmatprep.subr.bf16.mxu0 %v307_v5  ;;  %336 = vmatprep.subr.bf16.mxu1 %v307_v5  ;;  %v319_v16 = vpack.c.bf16 %v40_v15, %v39_v14  ;;  %v323_v19 = vpack.c.bf16 %v42_v18, %v41_v17  ;;  %v43_v20 = vld [vmem:[%s534_s1 + $0x60] sm:$0xff]  ;;  %v45_v23 = vld [vmem:[%s534_s1 + $0x70] sm:$0xff]  ;;  %v46_v24 = vld [vmem:[%s534_s1 + $0x78] sm:$0xff] }
   0x7   :  { %279 = vmatprep.mubr.f32.mxu0 %v15_v9  ;;  %291 = vmatprep.mubr.f32.mxu1 %v23_v10  ;;  %v327_v22 = vpack.c.bf16 %v44_v21, %v43_v20  ;;  %v331_v25 = vpack.c.bf16 %v46_v24, %v45_v23  ;;  %v16_v26 = vld [vmem:[%s535_s0 + $0x8] sm:$0xff]  ;;  %v17_v28 = vld [vmem:[%s535_s0 + $0x10] sm:$0xff]  ;;  %v18_v30 = vld [vmem:[%s535_s0 + $0x18] sm:$0xff] }
   0x8   :  { %v24_v27 = vld [vmem:[%s535_s0 + $0x48] sm:$0xff]  ;;  %v25_v29 = vld [vmem:[%s535_s0 + $0x50] sm:$0xff]  ;;  %v26_v31 = vld [vmem:[%s535_s0 + $0x58] sm:$0xff] }
   0x9   :  { %310 = vmatpush3.bf16.msra.mxu0 %v307_v5  ;;  %344 = vmatpush3.bf16.msra.mxu1 %v307_v5  ;;  %v19_v32 = vld [vmem:[%s535_s0 + $0x20] sm:$0xff]  ;;  %v20_v34 = vld [vmem:[%s535_s0 + $0x28] sm:$0xff]  ;;  %v21_v36 = vld [vmem:[%s535_s0 + $0x30] sm:$0xff] }
   0xa   :  { %312 = vmatprep.subr.bf16.mxu0 %v311_v8  ;;  %337 = vmatprep.subr.bf16.mxu1 %v311_v8  ;;  %v27_v33 = vld [vmem:[%s535_s0 + $0x60] sm:$0xff]  ;;  %v28_v35 = vld [vmem:[%s535_s0 + $0x68] sm:$0xff]  ;;  %v29_v37 = vld [vmem:[%s535_s0 + $0x70] sm:$0xff] }
   0xb   :  { %v22_v38 = vld [vmem:[%s535_s0 + $0x38] sm:$0xff] }
   0xc   :  { %v30_v39 = vld [vmem:[%s535_s0 + $0x78] sm:$0xff] }
   0xd   :  { %314 = vmatpush3.bf16.msra.mxu0 %v311_v8  ;;  %345 = vmatpush3.bf16.msra.mxu1 %v311_v8 }
   0xe   :  { %316 = vmatprep.subr.bf16.mxu0 %v315_v13  ;;  %338 = vmatprep.subr.bf16.mxu1 %v315_v13 }
  0x11   :  { %318 = vmatpush3.bf16.msra.mxu0 %v315_v13  ;;  %346 = vmatpush3.bf16.msra.mxu1 %v315_v13 }
  0x12   :  { %320 = vmatprep.subr.bf16.mxu0 %v319_v16  ;;  %339 = vmatprep.subr.bf16.mxu1 %v319_v16 }
  0x15   :  { %322 = vmatpush3.bf16.msra.mxu0 %v319_v16  ;;  %347 = vmatpush3.bf16.msra.mxu1 %v319_v16 }
  0x16   :  { %324 = vmatprep.subr.bf16.mxu0 %v323_v19  ;;  %340 = vmatprep.subr.bf16.mxu1 %v323_v19 }
  0x19   :  { %326 = vmatpush3.bf16.msra.mxu0 %v323_v19  ;;  %348 = vmatpush3.bf16.msra.mxu1 %v323_v19 }
  0x1a   :  { %328 = vmatprep.subr.bf16.mxu0 %v327_v22  ;;  %341 = vmatprep.subr.bf16.mxu1 %v327_v22 }
  0x1d   :  { %330 = vmatpush3.bf16.msra.mxu0 %v327_v22  ;;  %349 = vmatpush3.bf16.msra.mxu1 %v327_v22 }
  0x1e   :  { %332 = vmatprep.subr.bf16.mxu0 %v331_v25  ;;  %342 = vmatprep.subr.bf16.mxu1 %v331_v25 }
  0x21   :  { %334 = vmatpush3.bf16.msra.mxu0 %v331_v25  ;;  %350 = vmatpush3.bf16.msra.mxu1 %v331_v25 }
  0x24   :  { %280 = vmatmul.mubr.f32.vlgmr.msra.gmra.mrb[0].mxu0 %v16_v26  ;;  %292 = vmatmul.mubr.f32.vlgmr.msra.gmra.mrb[0].mxu1 %v24_v27 }
  0x25   :  { %282 = vmatprep.mubr.f32.mxu0 %v17_v28  ;;  %294 = vmatprep.mubr.f32.mxu1 %v25_v29 }
  0x28   :  { %283 = vmatmul.mubr.f32.gmra.mrb[2].mxu0 %v18_v30  ;;  %295 = vmatmul.mubr.f32.gmra.mrb[2].mxu1 %v26_v31 }
  0x29   :  { %285 = vmatprep.mubr.f32.mxu0 %v19_v32  ;;  %297 = vmatprep.mubr.f32.mxu1 %v27_v33 }
  0x2c   :  { %286 = vmatmul.mubr.f32.gmra.mrb[4].mxu0 %v20_v34  ;;  %298 = vmatmul.mubr.f32.gmra.mrb[4].mxu1 %v28_v35 }
  0x2d   :  { %288 = vmatprep.mubr.f32.mxu0 %v21_v36  ;;  %300 = vmatprep.mubr.f32.mxu1 %v29_v37 }
  0x30   :  { %289 = vmatmul.mubr.f32.gmra.mrb[6].mxu0 %v22_v38  ;;  %301 = vmatmul.mubr.f32.gmra.mrb[6].mxu1 %v30_v39 }
  0xf7   :  { %v281_v41 = vpop.f32.mrb[0].mxu0  ;;  %v293_v42 = vpop.f32.mrb[0].mxu1 }
  0xf8   :  { %v121_v43 = vadd.f32 %v281_v41, %v48_v40  ;;  %v161_v44 = vadd.f32 %v293_v42, %v48_v40  ;;  %v115_v45 = vpop.f32.mrb[1].mxu0  ;;  %v155_v46 = vpop.f32.mrb[1].mxu1 }
  0xf9   :  { %v116_v47 = vadd.f32 %v115_v45, %v48_v40  ;;  %v156_v48 = vadd.f32 %v155_v46, %v48_v40 }
  0xfa   :  { %196 = vst.msk [vmem:[%s537_s3 + $0x8] sm:$0xff] %vm194_vm0, %v121_v43  ;;  %204 = vst.msk [vmem:[%s537_s3 + $0x48] sm:$0xff] %vm194_vm0, %v161_v44 }
  0xfb   :  { %195 = vst.msk [vmem:[%s537_s3] sm:$0xff] %vm194_vm0, %v116_v47  ;;  %203 = vst.msk [vmem:[%s537_s3 + $0x40] sm:$0xff] %vm194_vm0, %v156_v48  ;;  %v284_v49 = vpop.f32.mrb[2].mxu0  ;;  %v296_v50 = vpop.f32.mrb[2].mxu1 }
  0xfc   :  { %v131_v51 = vadd.f32 %v284_v49, %v48_v40  ;;  %v171_v52 = vadd.f32 %v296_v50, %v48_v40  ;;  %v125_v53 = vpop.f32.mrb[3].mxu0  ;;  %v165_v54 = vpop.f32.mrb[3].mxu1 }
  0xfd   :  { %v126_v55 = vadd.f32 %v125_v53, %v48_v40  ;;  %v166_v56 = vadd.f32 %v165_v54, %v48_v40 }
  0xfe   :  { %198 = vst.msk [vmem:[%s537_s3 + $0x18] sm:$0xff] %vm194_vm0, %v131_v51  ;;  %206 = vst.msk [vmem:[%s537_s3 + $0x58] sm:$0xff] %vm194_vm0, %v171_v52 }
  0xff   :  { %197 = vst.msk [vmem:[%s537_s3 + $0x10] sm:$0xff] %vm194_vm0, %v126_v55  ;;  %205 = vst.msk [vmem:[%s537_s3 + $0x50] sm:$0xff] %vm194_vm0, %v166_v56  ;;  %v287_v57 = vpop.f32.mrb[4].mxu0  ;;  %v299_v58 = vpop.f32.mrb[4].mxu1 }
 0x100   :  { %v141_v59 = vadd.f32 %v287_v57, %v48_v40  ;;  %v181_v60 = vadd.f32 %v299_v58, %v48_v40  ;;  %v135_v61 = vpop.f32.mrb[5].mxu0  ;;  %v175_v62 = vpop.f32.mrb[5].mxu1 }
 0x101   :  { %v136_v63 = vadd.f32 %v135_v61, %v48_v40  ;;  %v176_v0 = vadd.f32 %v175_v62, %v48_v40 }
 0x102   :  { %200 = vst.msk [vmem:[%s537_s3 + $0x28] sm:$0xff] %vm194_vm0, %v141_v59  ;;  %208 = vst.msk [vmem:[%s537_s3 + $0x68] sm:$0xff] %vm194_vm0, %v181_v60 }
 0x103   :  { %199 = vst.msk [vmem:[%s537_s3 + $0x20] sm:$0xff] %vm194_vm0, %v136_v63  ;;  %207 = vst.msk [vmem:[%s537_s3 + $0x60] sm:$0xff] %vm194_vm0, %v176_v0  ;;  %v290_v1 = vpop.f32.mrb[6].mxu0  ;;  %v302_v2 = vpop.f32.mrb[6].mxu1 }
 0x104   :  { %v151_v3 = vadd.f32 %v290_v1, %v48_v40  ;;  %v191_v4 = vadd.f32 %v302_v2, %v48_v40  ;;  %v145_v5 = vpop.f32.mrb[7].mxu0  ;;  %v185_v6 = vpop.f32.mrb[7].mxu1 }
 0x105   :  { %v146_v7 = vadd.f32 %v145_v5, %v48_v40  ;;  %v186_v8 = vadd.f32 %v185_v6, %v48_v40 }
 0x106   :  { %202 = vst.msk [vmem:[%s537_s3 + $0x38] sm:$0xff] %vm194_vm0, %v151_v3  ;;  %210 = vst.msk [vmem:[%s537_s3 + $0x78] sm:$0xff] %vm194_vm0, %v191_v4 }
 0x107   :  { %201 = vst.msk [vmem:[%s537_s3 + $0x30] sm:$0xff] %vm194_vm0, %v146_v7  ;;  %209 = vst.msk [vmem:[%s537_s3 + $0x70] sm:$0xff] %vm194_vm0, %v186_v8 }

</bundles_post_ra>
